<compile_context>
chip_gen: v7x
topology: tpu7x:2x2x1
jax: 0.10.0
libtpu: 0.0.40
codegen_flags: <defaults>
</compile_context>

<pallas_src>
import functools

import numpy as np
import jax
import jax.numpy as jnp
from jax import lax
from jax.experimental import pallas as pl
from jax.experimental.pallas import tpu as pltpu


def _rim_kernel(masks_ref, x_ref, o_ref, *, img_w):
    """5-tap Laplacian on a (TB, H*W) tile: one image per sublane row."""
    m = masks_ref[...]                      # (4, HW) 0/1 border masks, compute dtype
    x = x_ref[...].astype(m.dtype)          # (TB, HW)
    hw = x.shape[-1]

    # Circular lane rolls (pltpu.roll needs non-negative shifts); the wrapped
    # border lanes are zeroed by the precomputed masks, which implements the
    # conv's zero padding.  Rolls stay within each sublane row, so images
    # never leak into each other (and padded rows of a partial block are
    # harmless garbage that the masked output store drops).
    up    = pltpu.roll(x, shift=img_w,      axis=1) * m[0:1]
    down  = pltpu.roll(x, shift=hw - img_w, axis=1) * m[1:2]
    left  = pltpu.roll(x, shift=1,          axis=1) * m[2:3]
    right = pltpu.roll(x, shift=hw - 1,     axis=1) * m[3:4]

    # Baked-in weights [[0,-1,0],[-1,4,-1],[0,-1,0]]: pure VPU add/sub/mul.
    o_ref[...] = (4.0 * x - (up + down) - (left + right)).astype(o_ref.dtype)


def _num_tensorcores_per_chip():
    """Best-effort: v7x has 2 TensorCores/chip, v5e/v6e have 1."""
    try:
        kind = jax.devices()[0].device_kind.lower()
        if "v7" in kind:
            return 2
    except Exception:
        pass
    return 1


def _choose_batch_block(n, row_bytes, sublane_mult, num_cores):
    """Images per grid step.

    Target ~6 MiB of input per step (4x tile double-buffered in+out stays well
    under v7x's 64 MiB VMEM), keep >=2 steps per TensorCore only on multi-TC
    parts, and keep the second-to-last block dim a multiple of the sublane
    packing unless it equals the full batch dim.
    """
    target = 6 << 20
    tb = max(1, target // max(row_bytes, 1))
    if num_cores > 1 and n > sublane_mult:
        # v7x: aim for >= 2 equal-ish steps per TensorCore so both stay busy.
        tb = min(tb, max(1, -(-n // (2 * num_cores))))
    tb = min(tb, n)
    if tb < n:
        tb = (tb // sublane_mult) * sublane_mult
        if tb == 0:
            # Huge per-image rows: take the smallest legal sublane block.
            # TODO(synk): for images > ~1 MiB each, fall back to a row-stacked
            # (N*H, W) layout with H-axis tiling to keep tiles small on v7x.
            tb = min(n, sublane_mult)
    return max(tb, 1)


def get_rim_strict(x):
    """x: (N, 1, H, W) -> (N, 1, H, W); conv2d with the fixed Laplacian kernel."""
    n, c, h, w = x.shape
    assert c == 1, "GetRimStrict expects a single input channel"
    hw = h * w

    in_dtype = jnp.dtype(x.dtype)
    itemsize = in_dtype.itemsize
    # bf16 math is fine on v6e/v7x VPUs; everything else computes in f32.
    if in_dtype in (jnp.dtype(jnp.float32), jnp.dtype(jnp.bfloat16)):
        compute_dtype = in_dtype
    else:
        compute_dtype = jnp.dtype(jnp.float32)

    # Precomputed 0/1 border masks, one lane-row per neighbor (trace-time
    # constants -> no iota/rem/select inside the kernel).
    f = np.arange(hw)
    m = np.ones((4, hw), np.float32)
    m[0, f < w] = 0.0            # up:    row 0 has no row above
    m[1, f >= hw - w] = 0.0      # down:  row H-1 has no row below
    m[2, f % w == 0] = 0.0       # left:  col 0 has no col to the left
    m[3, f % w == w - 1] = 0.0   # right: col W-1 has no col to the right
    masks = jnp.asarray(m, dtype=compute_dtype)

    # Lane-dense layout: one image per sublane row.  Free reshape.
    x2 = x.reshape(n, hw)

    sublane_mult = max(8, 32 // itemsize)          # 8 f32 / 16 bf16 / 32 int8
    tb = _choose_batch_block(n, hw * itemsize, sublane_mult,
                             _num_tensorcores_per_chip())
    grid = pl.cdiv(n, tb)

    # Explicit scoped-VMEM budget: 2 input + 2 output buffers + masks + slack.
    tile_bytes = tb * hw * itemsize
    mask_bytes = 4 * hw * jnp.dtype(compute_dtype).itemsize
    vmem_limit = int(min(100 << 20,
                         max(32 << 20, 4 * tile_bytes + 2 * mask_bytes + (4 << 20))))

    out2 = pl.pallas_call(
        functools.partial(_rim_kernel, img_w=w),
        out_shape=jax.ShapeDtypeStruct((n, hw), x.dtype),
        grid_spec=pltpu.PrefetchScalarGridSpec(
            num_scalar_prefetch=0,
            grid=(grid,),
            in_specs=[
                pl.BlockSpec((4, hw), lambda b: (0, 0)),    # masks: VMEM-resident
                pl.BlockSpec((tb, hw), lambda b: (b, 0)),
            ],
            out_specs=pl.BlockSpec((tb, hw), lambda b: (b, 0)),
        ),
        compiler_params=pltpu.CompilerParams(
            dimension_semantics=("parallel",),
            vmem_limit_bytes=vmem_limit),
    )(masks, x2)

    return out2.reshape(n, 1, h, w)


def _reference(x, weight):
    # Plain-JAX reference: conv2d NCHW, OIHW weight (1,1,3,3), padding=1.
    wgt = weight.reshape(1, 1, 3, 3)
    return lax.conv_general_dilated(
        x, wgt, window_strides=(1, 1), padding=((1, 1), (1, 1)),
        dimension_numbers=("NCHW", "OIHW", "NCHW"))


if __name__ == "__main__":
    key = jax.random.PRNGKey(0)
    N, C, H, W = 2, 1, 16, 16
    x = jax.random.normal(key, (N, C, H, W), dtype=jnp.float32)

    out = jax.block_until_ready(get_rim_strict(x))

    # Deterministic fixed (non-trainable) Laplacian kernel from __init__.
    weight = jnp.array([[0.0, -1.0, 0.0],
                        [-1.0, 4.0, -1.0],
                        [0.0, -1.0, 0.0]], dtype=jnp.float32)
    ref = jax.block_until_ready(_reference(x, weight))

    assert out.shape == (N, 1, H, W)
    assert jnp.allclose(out, ref, atol=1e-5, rtol=1e-5)

    print("KERNEL_OK")
</pallas_src>

<mosaic_0001>
module attributes {stable_mosaic.version = 11 : i64} {
  func.func @_rim_kernel(%arg0: i32, %arg1: memref<4x256xf32, #tpu.memory_space<vmem>>, %arg2: memref<2x256xf32, #tpu.memory_space<vmem>>, %arg3: memref<2x256xf32, #tpu.memory_space<vmem>>) attributes {dimension_semantics = [#tpu.dimension_semantics<parallel>], iteration_bounds = array<i64: 1>, scalar_prefetch = 0 : i64, scratch_operands = 0 : i64, tpu.core_type = #tpu.core_type<tc>, window_params = [{pipeline_mode = #tpu.pipeline_mode<synchronous>, transform_indices = @transform_0, window_bounds = array<i64: 4, 256>}, {transform_indices = @transform_1, window_bounds = array<i64: 2, 256>}, {transform_indices = @transform_2, window_bounds = array<i64: 2, 256>}]} {
    %c0 = arith.constant 0 : index
    %c0_0 = arith.constant 0 : index
    %0 = vector.load %arg1[%c0, %c0_0] : memref<4x256xf32, #tpu.memory_space<vmem>>, vector<4x256xf32>
    %c0_1 = arith.constant 0 : index
    %c0_2 = arith.constant 0 : index
    %1 = vector.load %arg2[%c0_1, %c0_2] : memref<2x256xf32, #tpu.memory_space<vmem>>, vector<2x256xf32>
    %c16_i32 = arith.constant 16 : i32
    %2 = tpu.dynamic_rotate %1 by %c16_i32 dim 1 : vector<2x256xf32>, i32 -> vector<2x256xf32>
    %3 = vector.extract_strided_slice %0 {offsets = [0, 0], sizes = [1, 256], strides = [1, 1]} : vector<4x256xf32> to vector<1x256xf32>
    %4 = vector.broadcast %3 : vector<1x256xf32> to vector<2x256xf32>
    %5 = arith.mulf %2, %4 : vector<2x256xf32>
    %c240_i32 = arith.constant 240 : i32
    %6 = tpu.dynamic_rotate %1 by %c240_i32 dim 1 : vector<2x256xf32>, i32 -> vector<2x256xf32>
    %7 = vector.extract_strided_slice %0 {offsets = [1, 0], sizes = [1, 256], strides = [1, 1]} : vector<4x256xf32> to vector<1x256xf32>
    %8 = vector.broadcast %7 : vector<1x256xf32> to vector<2x256xf32>
    %9 = arith.mulf %6, %8 : vector<2x256xf32>
    %c1_i32 = arith.constant 1 : i32
    %10 = tpu.dynamic_rotate %1 by %c1_i32 dim 1 : vector<2x256xf32>, i32 -> vector<2x256xf32>
    %11 = vector.extract_strided_slice %0 {offsets = [2, 0], sizes = [1, 256], strides = [1, 1]} : vector<4x256xf32> to vector<1x256xf32>
    %12 = vector.broadcast %11 : vector<1x256xf32> to vector<2x256xf32>
    %13 = arith.mulf %10, %12 : vector<2x256xf32>
    %c255_i32 = arith.constant 255 : i32
    %14 = tpu.dynamic_rotate %1 by %c255_i32 dim 1 : vector<2x256xf32>, i32 -> vector<2x256xf32>
    %15 = vector.extract_strided_slice %0 {offsets = [3, 0], sizes = [1, 256], strides = [1, 1]} : vector<4x256xf32> to vector<1x256xf32>
    %16 = vector.broadcast %15 : vector<1x256xf32> to vector<2x256xf32>
    %17 = arith.mulf %14, %16 : vector<2x256xf32>
    %cst = arith.constant 4.000000e+00 : f32
    %18 = vector.broadcast %cst : f32 to vector<2x256xf32>
    %19 = arith.mulf %18, %1 : vector<2x256xf32>
    %20 = arith.addf %5, %9 : vector<2x256xf32>
    %21 = arith.subf %19, %20 : vector<2x256xf32>
    %22 = arith.addf %13, %17 : vector<2x256xf32>
    %23 = arith.subf %21, %22 : vector<2x256xf32>
    %c0_3 = arith.constant 0 : index
    %c0_4 = arith.constant 0 : index
    %24 = vector.load %arg3[%c0_3, %c0_4] : memref<2x256xf32, #tpu.memory_space<vmem>>, vector<2x256xf32>
    tpu.vector_store %arg3[%c0_3, %c0_4], %23 {strides = array<i32>} : memref<2x256xf32, #tpu.memory_space<vmem>>, vector<2x256xf32>,
    return
  }
  func.func @transform_0(%arg0: i32) -> (i32, i32) {
    %c0_i32 = arith.constant 0 : i32
    %c0_i32_0 = arith.constant 0 : i32
    %c0_i32_1 = arith.constant 0 : i32
    return %c0_i32, %c0_i32_0 : i32, i32
  }
  func.func @transform_1(%arg0: i32) -> (i32, i32) {
    %c0_i32 = arith.constant 0 : i32
    %c0_i32_0 = arith.constant 0 : i32
    return %arg0, %c0_i32 : i32, i32
  }
  func.func @transform_2(%arg0: i32) -> (i32, i32) {
    %c0_i32 = arith.constant 0 : i32
    %c0_i32_0 = arith.constant 0 : i32
    return %arg0, %c0_i32 : i32, i32
  }
}

</mosaic_0001>

<bundles_post_ra>
// kernel: tpu_custom_call.1
= control target key start
LH: loop header
LB: loop body
LE: loop exit
PB: predicated region body
PF: predicated region fallthrough
CT: control target
= control target key end

     0   :  { %7 = vsyncpa [#allocation3], 0  ;;  %s360_s0 = inlined_call_operand.hbm [shape: f32[4,256], index: 0, kind: input, shape index: {}]   ;;  %s361_s1 = inlined_call_operand.hbm [shape: f32[2,256], index: 1, kind: input, shape index: {}]   ;;  %s362_s2 = inlined_call_operand.hbm [shape: f32[2,256], index: 2, kind: output, shape index: {}]  }
   0x1   :  { %8 = vsyncpa [#allocation6], 0 }
   0x2   :  { %9 = vsyncpa [#allocation4], 0  ;;  %s286_s9 = smov [#allocation2]   ;;  %s287_s11 = smov [#allocation5]  }
   0x3   :  { %s16_s10 = sshll.u32 %s286_s9, 4  ;;  %s26_s12 = sshll.u32 %s287_s11, 4  ;;  %s17_s10 = int_to_ptr.vmem [resolvable:$true] %s16_s10  ;;  %s27_s12 = int_to_ptr.vmem [resolvable:$true] %s26_s12 }
   0x4   :  { %s214_s15 = scalar_lea.hbm %s360_s0, 128 }
   0x5   :  { %p215_p0 = scmp.ne.s32.totalorder %s360_s0, %s214_s15  ;;  %p218_p1 = scmp.lt.u32.totalorder %s214_s15, %s360_s0 }
   0x7   :  { %p220_p2 = pnand %p218_p1, %p215_p0 }
   0x9   :  { %223 = shalt.err (!%p220_p2)
}
   0xa   :  { %s224_s20 = scalar_lea.vmem %s17_s10, 128  ;;  %p229_p4 = scmp.lt.s32.totalorder %s17_s10, %s17_s10 }
   0xb   :  { %p225_p3 = scmp.ne.s32.totalorder %s17_s10, %s224_s20  ;;  %p230_p5 = scmp.lt.s32.totalorder %s224_s20, %s224_s20 }
   0xd   :  { %p231_p6 = por %p230_p5, %p229_p4 }
   0xf   :  { %p232_p7 = pnand %p231_p6, %p225_p3 }
  0x11   :  { %235 = shalt.err (!%p232_p7)
}
  0x12   :  { %19 = dma.hbm_to_vmem [thread:$0]  %s360_s0, 128, %s17_s10, [#allocation3]  }
  0x13   :  { %s236_s25 = scalar_lea.hbm %s361_s1, 64 }
  0x14   :  { %p237_p8 = scmp.ne.s32.totalorder %s361_s1, %s236_s25  ;;  %p240_p9 = scmp.lt.u32.totalorder %s236_s25, %s361_s1 }
  0x16   :  { %p242_p10 = pnand %p240_p9, %p237_p8 }
  0x18   :  { %245 = shalt.err (!%p242_p10)
}
  0x19   :  { %s246_s30 = scalar_lea.vmem %s27_s12, 64  ;;  %p251_p12 = scmp.lt.s32.totalorder %s27_s12, %s27_s12 }
  0x1a   :  { %p247_p11 = scmp.ne.s32.totalorder %s27_s12, %s246_s30  ;;  %p252_p13 = scmp.lt.s32.totalorder %s246_s30, %s246_s30 }
  0x1c   :  { %p253_p0 = por %p252_p13, %p251_p12 }
  0x1e   :  { %p254_p1 = pnand %p253_p0, %p247_p11 }
  0x20   :  { %257 = shalt.err (!%p254_p1)
}
  0x21   :  { %29 = dma.hbm_to_vmem [thread:$0]  %s361_s1, 64, %s27_s12, [#allocation6]  }
  0x22   :  { %280 = dma.done.wait [#allocation3], 128  }
  0x23   :  { %281 = vsyncadd [#allocation3], 4294967168 }
  0x24   :  { %282 = dma.done.wait [#allocation6], 64  }
  0x25   :  { %283 = vsyncadd [#allocation6], 4294967232  ;;  %v42_v0 = vlaneseq  ;;  %v288_v1 = vmov 1983009808   ;;  %v335_v6 = vld [vmem:[#allocation5] sm:$0xf] }
  0x26   :  { %v40_v2 = vunpack.c.l.s4 %v288_v1  ;;  %s289_s4 = smov 112   ;;  %s290_s5 = smov 16   ;;  %v36_v11 = vld [vmem:[#allocation2] sm:$0xff]  ;;  %v160_v62 = vmul.f32 4.0, %v335_v6 }
  0x27   :  { %v43_v3 = vshrl.u32 %v42_v0, 7  ;;  %s291_s1 = smov 1   ;;  %s292_s6 = smov 127   ;;  %v54_v12 = vand.u32 127, %v42_v0 }
  0x28   :  { %v41_v4 = vunpack.c.0.s8 %v40_v2  ;;  %s293_s7 = smov [#allocation7]  }
  0x29   :  { %v88_v9 = vsub.s32 1, %v43_v3  ;;  %v92_v10 = vsub.s32 5, %v43_v3  ;;  %v115_v13 = vsub.s32 2, %v43_v3  ;;  %v119_v14 = vsub.s32 6, %v43_v3  ;;  %s196_s8 = sshll.u32 %s293_s7, 4  ;;  %s197_s8 = int_to_ptr.vmem [resolvable:$true] %s196_s8 }
  0x2a   :  { %v333_v5 = vsub.s32 %v41_v4, %v43_v3  ;;  %v61_v17 = vsub.s32 0, %v43_v3  ;;  %v65_v18 = vsub.s32 4, %v43_v3  ;;  %v142_v21 = vsub.s32 3, %v43_v3  ;;  %s258_s9 = scalar_lea.vmem %s197_s8, 64  ;;  %p263_p3 = scmp.lt.s32.totalorder %s197_s8, %s197_s8 }
  0x2b   :  { %v89_v15 = vrot.slane %v36_v11, %v88_v9  ;;  %v93_v16 = vrot.slane %v36_v11, %v92_v10  ;;  %v146_v22 = vsub.s32 7, %v43_v3  ;;  %vm83_vm0 = vcmp.lt.s32.totalorder %v54_v12, 112  ;;  %p259_p2 = scmp.ne.s32.totalorder %s197_s8, %s258_s9  ;;  %p264_p4 = scmp.lt.s32.totalorder %s258_s9, %s258_s9 }
  0x2c   :  { %v45_v7 = vrot.slane %v335_v6, %v333_v5  ;;  %v116_v23 = vrot.slane %v36_v11, %v115_v13  ;;  %v120_v24 = vrot.slane %v36_v11, %v119_v14  ;;  %v62_v27 = vrot.slane %v36_v11, %v61_v17 }
  0x2d   :  { %v99_v25 = vrot.slane %v89_v15, %v88_v9  ;;  %v103_v26 = vrot.slane %v93_v16, %v88_v9  ;;  %v66_v28 = vrot.slane %v36_v11, %v65_v18  ;;  %vm110_vm1 = vcmp.lt.s32.totalorder %v54_v12, 1  ;;  %p265_p5 = por %p264_p4, %p263_p3 }
  0x2e   :  { %79 = vrot.lane.b32.xlu1 %v45_v7, %s289_s4  ;;  %49 = vrot.lane.b32.xlu0 %v45_v7, %s290_s5  ;;  %v46_v8 = vcombine.high %v45_v7, %v45_v7  ;;  %vm55_vm2 = vcmp.lt.s32.totalorder %v54_v12, 16  ;;  %v143_v31 = vrot.slane %v36_v11, %v142_v21  ;;  %v147_v32 = vrot.slane %v36_v11, %v146_v22 }
  0x2f   :  { %v126_v35 = vrot.slane %v116_v23, %v115_v13  ;;  %v130_v36 = vrot.slane %v120_v24, %v115_v13  ;;  %v72_v39 = vrot.slane %v62_v27, %v61_v17  ;;  %v76_v40 = vrot.slane %v66_v28, %v61_v17  ;;  %p266_p6 = pnand %p265_p5, %p259_p2 }
  0x30   :  { %vm137_vm3 = vcmp.lt.s32.totalorder %v54_v12, 127  ;;  %v153_v43 = vrot.slane %v143_v31, %v142_v21  ;;  %v157_v44 = vrot.slane %v147_v32, %v142_v21 }
  0x32   :  { %106 = vrot.lane.b32.xlu0 %v45_v7, %s291_s1  ;;  %81 = vrot.lane.b32.xlu1 %v46_v8, %s289_s4 }
  0x36   :  { %108 = vrot.lane.b32.xlu1 %v46_v8, %s291_s1  ;;  %51 = vrot.lane.b32.xlu0 %v46_v8, %s290_s5 }
  0x3a   :  { %135 = vrot.lane.b32.xlu1 %v46_v8, %s292_s6  ;;  %133 = vrot.lane.b32.xlu0 %v45_v7, %s292_s6 }
  0xa0   :  { %v80_v19 = vpop.permute.xlu1 %79  ;;  %v50_v20 = vpop.permute.xlu0 %49 }
  0xa4   :  { %v107_v29 = vpop.permute.xlu0 %106  ;;  %v82_v30 = vpop.permute.xlu1 %81 }
  0xa5   :  { %v84_v33 = vsel %vm83_vm0, %v80_v19, %v82_v30  ;;  %v85_v34 = vsel %vm83_vm0, %v82_v30, %v80_v19 }
  0xa6   :  { %v104_v37 = vmul.f32 %v99_v25, %v84_v33  ;;  %v105_v38 = vmul.f32 %v103_v26, %v85_v34 }
  0xa8   :  { %v109_v41 = vpop.permute.xlu1 %108  ;;  %v52_v42 = vpop.permute.xlu0 %51 }
  0xa9   :  { %v111_v45 = vsel %vm110_vm1, %v107_v29, %v109_v41  ;;  %v112_v46 = vsel %vm110_vm1, %v109_v41, %v107_v29  ;;  %v56_v47 = vsel %vm55_vm2, %v50_v20, %v52_v42  ;;  %v57_v48 = vsel %vm55_vm2, %v52_v42, %v50_v20 }
  0xaa   :  { %v131_v49 = vmul.f32 %v126_v35, %v112_v46  ;;  %v132_v50 = vmul.f32 %v130_v36, %v111_v45  ;;  %v77_v51 = vmul.f32 %v72_v39, %v57_v48  ;;  %v78_v52 = vmul.f32 %v76_v40, %v56_v47 }
  0xac   :  { %v161_v53 = vadd.f32 %v104_v37, %v77_v51  ;;  %v162_v54 = vadd.f32 %v105_v38, %v78_v52  ;;  %v136_v55 = vpop.permute.xlu1 %135  ;;  %v134_v56 = vpop.permute.xlu0 %133 }
  0xad   :  { %v138_v57 = vsel %vm137_vm3, %v134_v56, %v136_v55  ;;  %v139_v58 = vsel %vm137_vm3, %v136_v55, %v134_v56 }
  0xae   :  { %v165_v59 = vcombine.low %v161_v53, %v162_v54  ;;  %v158_v60 = vmul.f32 %v153_v43, %v138_v57  ;;  %v159_v61 = vmul.f32 %v157_v44, %v139_v58 }
  0xb0   :  { %v175_v63 = vadd.f32 %v158_v60, %v131_v49  ;;  %v176_v0 = vadd.f32 %v159_v61, %v132_v50  ;;  %v172_v1 = vrot.slane %v165_v59, %v333_v5 }
  0xb2   :  { %v179_v2 = vcombine.low %v175_v63, %v176_v0  ;;  %v174_v3 = vsub.f32 %v160_v62, %v172_v1 }
  0xb4   :  { %v186_v4 = vrot.slane %v179_v2, %v333_v5 }
  0xb6   :  { %v188_v7 = vsub.f32 %v174_v3, %v186_v4 }
  0xb8   :  { %189 = vst [vmem:[#allocation7] sm:$0xf] %v188_v7 }
  0xb9   :  { %269 = shalt.err (!%p266_p6)
}
  0xba   :  { %s270_s12 = scalar_lea.hbm %s362_s2, 64 }
  0xbb   :  { %p271_p7 = scmp.ne.s32.totalorder %s362_s2, %s270_s12  ;;  %p274_p8 = scmp.lt.u32.totalorder %s270_s12, %s362_s2 }
  0xbd   :  { %p276_p9 = pnand %p274_p8, %p271_p7 }
  0xbf   :  { %279 = shalt.err (!%p276_p9)
}
  0xc0   :  { %199 = dma.vmem_to_hbm [thread:$0]  %s197_s8, 64, %s362_s2, [#allocation4]  }
  0xc1   :  { %284 = dma.done.wait [#allocation4], 64  }
  0xc2   :  { %285 = vsyncadd [#allocation4], 4294967232 }
  0xc3   :  { %203 = vsyncpa [#allocation3], 1 }
  0xc4   :  { %204 = vsyncpa [#allocation6], 1 }
  0xc5   :  { %205 = vsyncpa [#allocation4], 1 }

</bundles_post_ra>
